<compile_context>
chip_gen: v6e
topology: v6e:2x2x1
jax: 0.10.0
libtpu: 0.0.40
codegen_flags: <defaults>
</compile_context>

<pallas_src>
import math
import functools

import jax
import jax.numpy as jnp
from jax.experimental import pallas as pl
from jax.experimental.pallas import tpu as pltpu

MU = 0.707107
SIGMA = 0.282095

# ~4 MiB of input bytes per grid step; in+out double buffering => ~16 MiB of
# VMEM buffers, so raise the scoped-VMEM limit explicitly (32 MiB fits every
# generation, including v7x's 64 MiB physical VMEM per TensorCore).
BLOCK_BYTES_TARGET = 4 * 1024 * 1024
VMEM_LIMIT_BYTES = 32 * 1024 * 1024
_LANE_WIDTH_CANDIDATES = (4096, 2048, 1024, 512, 256, 128)


def _laplace_kernel(x_ref, o_ref, *, inv, bias):
    # Compute in f32 regardless of storage dtype; cast back at the store.
    # TODO(synk): on v7x (3.2 TB/s HBM) check the bundle dump for VALU
    # saturation from the erf polynomial with bf16 inputs; if VALU binds,
    # consider an EUP-friendly CDF approximation (needs tolerance re-check).
    x = x_ref[...].astype(jnp.float32)
    z = x * inv + bias                        # folded (x - mu) / (sigma*sqrt(2))
    o_ref[...] = (0.5 * (1.0 + jax.lax.erf(z))).astype(o_ref.dtype)


def _choose_width(n):
    """Widest lane width that divides n. Prefer widths keeping rows % 8 == 0
    so both lane and sublane dims are dense (unmasked stores, fewer vregs)."""
    for cand in _LANE_WIDTH_CANDIDATES:
        if n % cand == 0 and (n // cand) % 8 == 0:
            return cand
    for cand in _LANE_WIDTH_CANDIDATES:
        if n % cand == 0:
            return cand
    return None


def _grid_semantics():
    """Use CORE_PARALLEL only on chips with 2 TensorCores per chip (v7x);
    on v5e/v6e (1 TC) the plain string is equivalent and always safe."""
    try:
        kind = jax.devices()[0].device_kind
    except Exception:
        kind = ""
    if "7" in kind:
        return (pltpu.CORE_PARALLEL,)
    return ("parallel",)


def _laplace_2d(x2d, inv, bias, semantics):
    rows, width = x2d.shape
    itemsize = jnp.dtype(x2d.dtype).itemsize

    # Block sizing: ~BLOCK_BYTES_TARGET of input per step, sublane dim a
    # multiple of 8 (or the full row count for short slabs -> full-extent
    # block, (8,128) divisibility waived).
    block_rows = max(8, BLOCK_BYTES_TARGET // (width * itemsize))
    block_rows = (block_rows // 8) * 8
    if block_rows >= rows:
        block_rows = rows

    n = rows * width
    cost = pl.CostEstimate(
        flops=6 * n,
        transcendentals=n,
        bytes_accessed=2 * n * itemsize,
    )

    return pl.pallas_call(
        functools.partial(_laplace_kernel, inv=inv, bias=bias),
        out_shape=jax.ShapeDtypeStruct((rows, width), x2d.dtype),
        grid_spec=pltpu.PrefetchScalarGridSpec(
            num_scalar_prefetch=0,
            grid=(pl.cdiv(rows, block_rows),),
            in_specs=[pl.BlockSpec((block_rows, width), lambda i: (i, 0))],
            out_specs=pl.BlockSpec((block_rows, width), lambda i: (i, 0)),
        ),
        compiler_params=pltpu.CompilerParams(
            dimension_semantics=semantics,
            vmem_limit_bytes=VMEM_LIMIT_BYTES,
        ),
        cost_estimate=cost,
    )(x2d)


def laplace_pallas(x, mu=MU, sigma=SIGMA):
    """Elementwise Laplace activation: 0.5 * (1 + erf((x - mu) / (sigma*sqrt(2))))."""
    orig_shape = x.shape
    n = x.size
    inv = 1.0 / (float(sigma) * math.sqrt(2.0))
    bias = -float(mu) * inv

    flat = jnp.reshape(x, (-1,))

    # Only the 128-aligned prefix goes through the kernel; any <128-element
    # tail is handled with plain jnp (no full-array pad + slice passes).
    n_main = (n // 128) * 128
    if n_main == 0:
        z = flat.astype(jnp.float32) * inv + bias
        return (0.5 * (1.0 + jax.lax.erf(z))).astype(x.dtype).reshape(orig_shape)

    width = _choose_width(n_main)
    rows = n_main // width
    main = flat if n_main == n else flat[:n_main]
    x2d = jnp.reshape(main, (rows, width))

    semantics = _grid_semantics()
    try:
        out2d = _laplace_2d(x2d, inv, bias, semantics)
    except Exception:
        if semantics == ("parallel",):
            raise
        # Safe fallback if CORE_PARALLEL is rejected on this chip/toolchain.
        out2d = _laplace_2d(x2d, inv, bias, ("parallel",))

    out_flat = jnp.reshape(out2d, (-1,))
    if n_main != n:
        z_tail = flat[n_main:].astype(jnp.float32) * inv + bias
        tail = (0.5 * (1.0 + jax.lax.erf(z_tail))).astype(x.dtype)
        out_flat = jnp.concatenate([out_flat, tail])
    return jnp.reshape(out_flat, orig_shape)


def laplace_ref(x, mu=MU, sigma=SIGMA):
    z = (x - mu) / (sigma * math.sqrt(2.0))
    return 0.5 * (1.0 + jax.lax.erf(z))


if __name__ == "__main__":
    key = jax.random.PRNGKey(0)

    # Small NCHW-shaped input consistent with an activation used after a conv.
    x = jax.random.normal(key, (2, 4, 16, 16), dtype=jnp.float32)
    y = jax.block_until_ready(laplace_pallas(x))
    y_ref = laplace_ref(x)
    assert y.shape == x.shape and y.dtype == x.dtype
    assert jnp.allclose(y, y_ref, atol=1e-5, rtol=1e-5)

    # Exercises the widest-divisor fallback (rows not a multiple of 8).
    x2 = jax.random.normal(jax.random.PRNGKey(1), (2, 3, 16, 16), dtype=jnp.float32)
    y2 = jax.block_until_ready(laplace_pallas(x2))
    assert jnp.allclose(y2, laplace_ref(x2), atol=1e-5, rtol=1e-5)

    # Exercises the 128-aligned-prefix + jnp-tail path (5*7*11 = 385 = 3*128 + 1).
    x3 = jax.random.normal(jax.random.PRNGKey(2), (5, 7, 11), dtype=jnp.float32)
    y3 = jax.block_until_ready(laplace_pallas(x3))
    assert jnp.allclose(y3, laplace_ref(x3), atol=1e-5, rtol=1e-5)

    print("KERNEL_OK")
</pallas_src>

<mosaic_0001>
module attributes {stable_mosaic.version = 11 : i64} {
  func.func @_laplace_kernel(%arg0: i32, %arg1: memref<8x256xf32, #tpu.memory_space<vmem>>, %arg2: memref<8x256xf32, #tpu.memory_space<vmem>>) attributes {dimension_semantics = [#tpu.dimension_semantics<parallel>], iteration_bounds = array<i64: 1>, scalar_prefetch = 0 : i64, scratch_operands = 0 : i64, tpu.core_type = #tpu.core_type<tc>, window_params = [{transform_indices = @transform_0, window_bounds = array<i64: 8, 256>}, {transform_indices = @transform_1, window_bounds = array<i64: 8, 256>}]} {
    %c0 = arith.constant 0 : index
    %c0_0 = arith.constant 0 : index
    %0 = vector.load %arg1[%c0, %c0_0] : memref<8x256xf32, #tpu.memory_space<vmem>>, vector<8x256xf32>
    %cst = arith.constant 2.50662637 : f32
    %1 = vector.broadcast %cst : f32 to vector<8x256xf32>
    %2 = arith.mulf %0, %1 : vector<8x256xf32>
    %cst_1 = arith.constant -1.77245307 : f32
    %3 = vector.broadcast %cst_1 : f32 to vector<8x256xf32>
    %4 = arith.addf %2, %3 : vector<8x256xf32>
    %5 = math.erf %4 : vector<8x256xf32>
    %cst_2 = arith.constant 1.000000e+00 : f32
    %6 = vector.broadcast %cst_2 : f32 to vector<8x256xf32>
    %7 = arith.addf %6, %5 : vector<8x256xf32>
    %cst_3 = arith.constant 5.000000e-01 : f32
    %8 = vector.broadcast %cst_3 : f32 to vector<8x256xf32>
    %9 = arith.mulf %8, %7 : vector<8x256xf32>
    %c0_4 = arith.constant 0 : index
    %c0_5 = arith.constant 0 : index
    %10 = vector.load %arg2[%c0_4, %c0_5] : memref<8x256xf32, #tpu.memory_space<vmem>>, vector<8x256xf32>
    tpu.vector_store %arg2[%c0_4, %c0_5], %9 {strides = array<i32>} : memref<8x256xf32, #tpu.memory_space<vmem>>, vector<8x256xf32>,
    return
  }
  func.func @transform_0(%arg0: i32) -> (i32, i32) {
    %c0_i32 = arith.constant 0 : i32
    %c0_i32_0 = arith.constant 0 : i32
    return %arg0, %c0_i32 : i32, i32
  }
  func.func @transform_1(%arg0: i32) -> (i32, i32) {
    %c0_i32 = arith.constant 0 : i32
    %c0_i32_0 = arith.constant 0 : i32
    return %arg0, %c0_i32 : i32, i32
  }
}

</mosaic_0001>

<bundles_post_ra>
// kernel: tpu_custom_call.1
= control target key start
LH: loop header
LB: loop body
LE: loop exit
PB: predicated region body
PF: predicated region fallthrough
CT: control target
= control target key end

     0   :  { %6 = vsyncpa [#allocation3], 0  ;;  %s118_s0 = inlined_call_operand.hbm [shape: f32[8,256], index: 0, kind: input, shape index: {}]   ;;  %s119_s1 = inlined_call_operand.hbm [shape: f32[8,256], index: 1, kind: output, shape index: {}]  }
   0x1   :  { %7 = vsyncpa [#allocation4], 0  ;;  %s100_s6 = smov [#allocation2]  }
   0x2   :  { %s14_s7 = sshll.u32 %s100_s6, 4  ;;  %s15_s7 = int_to_ptr.vmem [resolvable:$true] %s14_s7 }
   0x3   :  { %s64_s8 = scalar_lea.vmem %s15_s7, 256  ;;  %p69_p1 = scmp.lt.s32.totalorder %s15_s7, %s15_s7 }
   0x4   :  { %p65_p0 = scmp.ne.s32.totalorder %s15_s7, %s64_s8  ;;  %p70_p2 = scmp.lt.s32.totalorder %s64_s8, %s64_s8 }
   0x6   :  { %p71_p3 = por %p70_p2, %p69_p1 }
   0x8   :  { %p72_p4 = pnand %p71_p3, %p65_p0 }
   0xa   :  { %75 = shalt.err (!%p72_p4)
}
   0xb   :  { %17 = dma.hbm_to_vmem [thread:$0]  %s118_s0, 256, %s15_s7, [#allocation3]  }
   0xc   :  { %96 = dma.done.wait [#allocation3], 256  }
   0xd   :  { %97 = vsyncadd [#allocation3], 4294967040  ;;  %v21_v0 = vld [vmem:[#allocation2] sm:$0xff]  ;;  %v22_v1 = vld [vmem:[#allocation2 + $0x8] sm:$0xff]  ;;  %s101_s11 = smov [#allocation5]  }
   0xe   :  { %v23_v2 = vmul.f32 2.5066264, %v21_v0  ;;  %v24_v3 = vmul.f32 2.5066264, %v22_v1  ;;  %s41_s12 = sshll.u32 %s101_s11, 4  ;;  %s42_s12 = int_to_ptr.vmem [resolvable:$true] %s41_s12 }
   0xf   :  { %s76_s0 = scalar_lea.vmem %s42_s12, 256  ;;  %p81_p6 = scmp.lt.s32.totalorder %s42_s12, %s42_s12 }
  0x10   :  { %v25_v4 = vadd.f32 -1.7724531, %v23_v2  ;;  %v26_v5 = vadd.f32 -1.7724531, %v24_v3  ;;  %p77_p5 = scmp.ne.s32.totalorder %s42_s12, %s76_s0  ;;  %p82_p7 = scmp.lt.s32.totalorder %s76_s0, %s76_s0 }
  0x12   :  { %52 = verf.f32 %v25_v4  ;;  %p83_p8 = por %p82_p7, %p81_p6 }
  0x13   :  { %54 = verf.f32 %v26_v5 }
  0x14   :  { %p84_p9 = pnand %p83_p8, %p77_p5 }
  0x1f   :  { %v53_v6 = vpop.eup %52 }
  0x20   :  { %v55_v7 = vpop.eup %54  ;;  %v29_v8 = vadd.f32 1.0, %v53_v6 }
  0x21   :  { %v30_v9 = vadd.f32 1.0, %v55_v7 }
  0x22   :  { %v31_v10 = vmul.f32 0.5, %v29_v8 }
  0x23   :  { %v32_v11 = vmul.f32 0.5, %v30_v9 }
  0x24   :  { %33 = vst [vmem:[#allocation5] sm:$0xff] %v31_v10 }
  0x25   :  { %34 = vst [vmem:[#allocation5 + $0x8] sm:$0xff] %v32_v11 }
  0x26   :  { %87 = shalt.err (!%p84_p9)
}
  0x27   :  { %44 = dma.vmem_to_hbm [thread:$0]  %s42_s12, 256, %s119_s1, [#allocation4]  }
  0x28   :  { %98 = dma.done.wait [#allocation4], 256  }
  0x29   :  { %99 = vsyncadd [#allocation4], 4294967040 }
  0x2a   :  { %48 = vsyncpa [#allocation3], 1 }
  0x2b   :  { %49 = vsyncpa [#allocation4], 1 }

</bundles_post_ra>
